<compile_context>
chip_gen: v5e
topology: v5e:2x2
jax: 0.10.0
libtpu: 0.0.40
codegen_flags: <defaults>
</compile_context>

<pallas_src>
import jax
import jax.numpy as jnp
from jax.experimental import pallas as pl
from jax.experimental.pallas import tpu as pltpu

# ----------------------------- problem sizes --------------------------------
BATCH  = 2
SEQ    = 16
DIM    = 128          # nn.LayerNorm(dim); lane-dense (multiple of 128)
EPS_LN = 1e-5         # nn.LayerNorm default eps


# ------------------------------- kernel -------------------------------------

def prenorm_kernel(x_ref, vec_ref, w_ref, o_ref):
    """Fused PreNorm forward, single step over the flattened batch.

    x_ref   : (M, DIM)  f32   activations, M = BATCH * SEQ
    vec_ref : (3, DIM)  f32   packed [gamma; beta; fn_bias]  (single DMA)
    w_ref   : (DIM, DIM) bf16 fn = Linear(dim, dim) weight, stored (in, out)
    o_ref   : (M, DIM)  f32
    """
    x = x_ref[...].astype(jnp.float32)               # (M, D)

    v = vec_ref[...]                                  # (3, D) — one VMEM load
    gamma = v[0:1]                                    # (1, D), broadcasts
    beta  = v[1:2]
    bias  = v[2:3]

    # ---- self.norm(x): LayerNorm over the last dim, one-pass statistics ----
    inv_d = 1.0 / x.shape[-1]
    s     = jnp.sum(x, axis=-1, keepdims=True)        # independent XLU reduce
    ss    = jnp.sum(x * x, axis=-1, keepdims=True)    # independent XLU reduce
    mean  = s * inv_d
    var   = ss * inv_d - mean * mean                  # E[x^2] - E[x]^2 (f32)
    xn    = (x - mean) * jax.lax.rsqrt(var + EPS_LN) * gamma + beta

    # ---- self.fn(x): Linear(dim, dim), bf16 MXU inputs, f32 accumulation ---
    y = jnp.dot(xn.astype(jnp.bfloat16), w_ref[...],
                preferred_element_type=jnp.float32) + bias
    o_ref[...] = y.astype(o_ref.dtype)


# ------------------------------- wrapper -------------------------------------

def prenorm_forward(x, gamma, beta, w, b):
    """x: (B, SEQ, DIM) batch-first.  gamma/beta: (DIM,) LayerNorm affine.
    w: (DIM, DIM) fn weight stored (in, out).  b: (DIM,) fn bias."""
    bsz, n, d = x.shape
    m = bsz * n
    x2d    = x.reshape(m, d).astype(jnp.float32)
    vecs   = jnp.stack([gamma, beta, b], axis=0).astype(jnp.float32)  # (3, D)
    w_bf16 = w.astype(jnp.bfloat16)          # bf16 MXU path, halves weight DMA

    cost = pl.CostEstimate(
        flops=2 * m * d * d + 8 * m * d,     # matmul + LN elementwise
        transcendentals=m,                   # one rsqrt per row
        bytes_accessed=(x2d.size * 4) + (w_bf16.size * 2)
                       + (vecs.size * 4) + (m * d * 4),
    )

    out = pl.pallas_call(
        prenorm_kernel,
        out_shape=jax.ShapeDtypeStruct((m, d), jnp.float32),
        # Single grid-less step: every operand is one full-array VMEM block,
        # so nothing is double-buffered and there is no per-step overhead.
        in_specs=[
            pl.BlockSpec(memory_space=pltpu.MemorySpace.VMEM),   # activations
            pl.BlockSpec(memory_space=pltpu.MemorySpace.VMEM),   # packed vecs
            pl.BlockSpec(memory_space=pltpu.MemorySpace.VMEM),   # fn weight
        ],
        out_specs=pl.BlockSpec(memory_space=pltpu.MemorySpace.VMEM),
        cost_estimate=cost,
    )(x2d, vecs, w_bf16)
    return out.reshape(bsz, n, d)


# --------------------------------- main --------------------------------------

if __name__ == "__main__":
    key = jax.random.PRNGKey(0)
    kx, kg, kb, kw, kbb = jax.random.split(key, 5)

    # Deterministic small inputs consistent with PreNorm(dim=128, fn=Linear).
    x     = jax.random.normal(kx, (BATCH, SEQ, DIM), jnp.float32)
    gamma = 1.0 + 0.05 * jax.random.normal(kg, (DIM,), jnp.float32)
    beta  = 0.05 * jax.random.normal(kb, (DIM,), jnp.float32)
    # PyTorch nn.Linear stores weight as (out, in); we keep it (in, out) so the
    # kernel needs no transpose.
    w     = 0.05 * jax.random.normal(kw, (DIM, DIM), jnp.float32)
    bias  = 0.05 * jax.random.normal(kbb, (DIM,), jnp.float32)

    out = prenorm_forward(x, gamma, beta, w, bias)
    out = jax.block_until_ready(out)

    # Pure-JAX references for correctness sanity checks.
    mean = jnp.mean(x, axis=-1, keepdims=True)
    var  = jnp.mean((x - mean) ** 2, axis=-1, keepdims=True)
    xn   = (x - mean) * jax.lax.rsqrt(var + EPS_LN) * gamma + beta
    # Reference with the same bf16 matmul operands (tight tolerance).
    ref_bf16 = jnp.einsum(
        "bnd,de->bne", xn.astype(jnp.bfloat16), w.astype(jnp.bfloat16),
        preferred_element_type=jnp.float32).astype(jnp.float32) + bias
    # Full-f32 reference (loose tolerance, bounds the bf16 quantization error).
    ref_f32 = jnp.einsum("bnd,de->bne", xn, w) + bias

    assert out.shape == (BATCH, SEQ, DIM), out.shape
    assert bool(jnp.all(jnp.isfinite(out)))
    assert bool(jnp.allclose(out, ref_bf16, atol=2e-3, rtol=2e-3))
    assert bool(jnp.allclose(out, ref_f32, atol=3e-2, rtol=3e-2))
    print("KERNEL_OK")
</pallas_src>

<mosaic_0001>
module attributes {stable_mosaic.version = 11 : i64} {
  func.func @prenorm_kernel(%arg0: memref<32x128xf32, #tpu.memory_space<vmem>>, %arg1: memref<3x128xf32, #tpu.memory_space<vmem>>, %arg2: memref<128x128xbf16, #tpu.memory_space<vmem>>, %arg3: memref<32x128xf32, #tpu.memory_space<vmem>>) attributes {dimension_semantics = [], scalar_prefetch = 0 : i64, scratch_operands = 0 : i64, tpu.core_type = #tpu.core_type<tc>} {
    %c0 = arith.constant 0 : index
    %c0_0 = arith.constant 0 : index
    %0 = vector.load %arg0[%c0, %c0_0] : memref<32x128xf32, #tpu.memory_space<vmem>>, vector<32x128xf32>
    %c0_1 = arith.constant 0 : index
    %c0_2 = arith.constant 0 : index
    %1 = vector.load %arg1[%c0_1, %c0_2] : memref<3x128xf32, #tpu.memory_space<vmem>>, vector<3x128xf32>
    %2 = vector.extract_strided_slice %1 {offsets = [0, 0], sizes = [1, 128], strides = [1, 1]} : vector<3x128xf32> to vector<1x128xf32>
    %3 = vector.extract_strided_slice %1 {offsets = [1, 0], sizes = [1, 128], strides = [1, 1]} : vector<3x128xf32> to vector<1x128xf32>
    %4 = vector.extract_strided_slice %1 {offsets = [2, 0], sizes = [1, 128], strides = [1, 1]} : vector<3x128xf32> to vector<1x128xf32>
    %cst = arith.constant dense<0.000000e+00> : vector<32xf32>
    %5 = vector.multi_reduction <add>, %0, %cst [1] : vector<32x128xf32> to vector<32xf32>
    %6 = vector.shape_cast %5 : vector<32xf32> to vector<32x1xf32>
    %7 = arith.mulf %0, %0 : vector<32x128xf32>
    %cst_3 = arith.constant dense<0.000000e+00> : vector<32xf32>
    %8 = vector.multi_reduction <add>, %7, %cst_3 [1] : vector<32x128xf32> to vector<32xf32>
    %9 = vector.shape_cast %8 : vector<32xf32> to vector<32x1xf32>
    %cst_4 = arith.constant 7.812500e-03 : f32
    %10 = vector.broadcast %cst_4 : f32 to vector<32x1xf32>
    %11 = arith.mulf %6, %10 : vector<32x1xf32>
    %cst_5 = arith.constant 7.812500e-03 : f32
    %12 = vector.broadcast %cst_5 : f32 to vector<32x1xf32>
    %13 = arith.mulf %9, %12 : vector<32x1xf32>
    %14 = arith.mulf %11, %11 : vector<32x1xf32>
    %15 = arith.subf %13, %14 : vector<32x1xf32>
    %16 = vector.broadcast %11 : vector<32x1xf32> to vector<32x128xf32>
    %17 = arith.subf %0, %16 : vector<32x128xf32>
    %cst_6 = arith.constant 9.99999974E-6 : f32
    %18 = vector.broadcast %cst_6 : f32 to vector<32x1xf32>
    %19 = arith.addf %15, %18 : vector<32x1xf32>
    %20 = math.rsqrt %19 : vector<32x1xf32>
    %21 = vector.broadcast %20 : vector<32x1xf32> to vector<32x128xf32>
    %22 = arith.mulf %17, %21 : vector<32x128xf32>
    %23 = vector.broadcast %2 : vector<1x128xf32> to vector<32x128xf32>
    %24 = arith.mulf %22, %23 : vector<32x128xf32>
    %25 = vector.broadcast %3 : vector<1x128xf32> to vector<32x128xf32>
    %26 = arith.addf %24, %25 : vector<32x128xf32>
    %27 = arith.truncf %26 : vector<32x128xf32> to vector<32x128xbf16>
    %c0_7 = arith.constant 0 : index
    %c0_8 = arith.constant 0 : index
    %28 = vector.load %arg2[%c0_7, %c0_8] : memref<128x128xbf16, #tpu.memory_space<vmem>>, vector<128x128xbf16>
    %cst_9 = arith.constant dense<0.000000e+00> : vector<32x128xf32>
    %29 = tpu.matmul %27, %28, %cst_9 {dimension_numbers = #tpu.dot_dimension_numbers<[1], [0], [0], [1], [0, 0, 1, 1], [], []>} : vector<32x128xbf16>, vector<128x128xbf16>, vector<32x128xf32> -> vector<32x128xf32>
    %30 = vector.broadcast %4 : vector<1x128xf32> to vector<32x128xf32>
    %31 = arith.addf %29, %30 : vector<32x128xf32>
    %c0_10 = arith.constant 0 : index
    %c0_11 = arith.constant 0 : index
    %32 = vector.load %arg3[%c0_10, %c0_11] : memref<32x128xf32, #tpu.memory_space<vmem>>, vector<32x128xf32>
    tpu.vector_store %arg3[%c0_10, %c0_11], %31 {strides = array<i32>} : memref<32x128xf32, #tpu.memory_space<vmem>>, vector<32x128xf32>,
    return
  }
}

</mosaic_0001>

<bundles_post_ra>
// kernel: tpu_custom_call.1
= control target key start
LH: loop header
LB: loop body
LE: loop exit
PB: predicated region body
PF: predicated region fallthrough
CT: control target
= control target key end

     0   :  { %8 = vsyncpa [#allocation3], 0  ;;  %s519_s0 = inlined_call_operand.hbm [shape: f32[32,128], index: 0, kind: input, shape index: {}]   ;;  %s520_s1 = inlined_call_operand.hbm [shape: f32[3,128], index: 1, kind: input, shape index: {}]   ;;  %s521_s2 = inlined_call_operand.hbm [shape: bf16[128,128], index: 2, kind: input, shape index: {}]   ;;  %s522_s3 = inlined_call_operand.hbm [shape: f32[32,128], index: 3, kind: output, shape index: {}]  }
   0x1   :  { %9 = vsyncpa [#allocation6], 0  ;;  %s29_s14 = sshll.u32 %s520_s1, 4  ;;  %s30_s14 = int_to_ptr.hbm [resolvable:$true] %s29_s14 }
   0x2   :  { %10 = vsyncpa [#allocation4], 0  ;;  %s439_s15 = smov [#allocation5]   ;;  %s15_s19 = sshll.u32 %s519_s0, 4  ;;  %s16_s19 = int_to_ptr.hbm [resolvable:$true] %s15_s19 }
   0x3   :  { %s31_s16 = sshll.u32 %s439_s15, 4  ;;  %s440_s20 = smov [#allocation2]   ;;  %s32_s16 = int_to_ptr.vmem [resolvable:$true] %s31_s16 }
   0x4   :  { %34 = dma.hbm_to_vmem [thread:$0]  %s30_s14, 64, %s32_s16, [#allocation6]  }
   0x5   :  { %s17_s21 = sshll.u32 %s440_s20, 4  ;;  %s441_s22 = smov 128   ;;  %s18_s21 = int_to_ptr.vmem [resolvable:$true] %s17_s21 }
   0x6   :  { %s442_s23 = smov 8   ;;  %s39_s25 = sshll.u32 %s521_s2, 4  ;;  %s40_s25 = int_to_ptr.hbm [resolvable:$true] %s39_s25 }
   0x7   :  { %23 = dma.hbm_to_vmem [thread:$0]  %s16_s19, 512, %s18_s21, [#allocation3], %s441_s22, %s441_s22, %s442_s23  }
   0x8   :  { %s443_s26 = smov [#allocation7]   ;;  %s444_s0 = smov 64  }
   0x9   :  { %s41_s27 = sshll.u32 %s443_s26, 4  ;;  %s445_s28 = smov 4   ;;  %s42_s27 = int_to_ptr.vmem [resolvable:$true] %s41_s27 }
   0xa   :  { %47 = dma.hbm_to_vmem [thread:$0]  %s40_s25, 1024, %s42_s27, [#allocation6], %s444_s0, %s444_s0, %s445_s28  }
   0xb   :  { %433 = dma.done.wait [#allocation3], 512  }
   0xc   :  { %434 = vsyncadd [#allocation3], 4294966784 }
   0xd   :  { %435 = dma.done.wait [#allocation6], 1088  }
   0xe   :  { %436 = vsyncadd [#allocation6], 4294966208  ;;  %v479_v0 = vld [vmem:[#allocation2 + $0x10] sm:$0xff]  ;;  %v481_v1 = vld [vmem:[#allocation2] sm:$0xff]  ;;  %s446_s2 = smov [#allocation8]   ;;  %s259_s5 = sshll.u32 %s522_s3, 4  ;;  %s260_s5 = int_to_ptr.hbm [resolvable:$true] %s259_s5 }
   0xf   :  { %69 = vadd.xlane.f32.xlu1 %v479_v0  ;;  %65 = vadd.xlane.f32.xlu0 %v481_v1  ;;  %v73_v2 = vmul.f32 %v481_v1, %v481_v1  ;;  %v487_v3 = vld [vmem:[#allocation2 + $0x8] sm:$0xff]  ;;  %v489_v4 = vld [vmem:[#allocation2 + $0x18] sm:$0xff]  ;;  %v75_v7 = vmul.f32 %v479_v0, %v479_v0  ;;  %v64_v55 = vld [vmem:[#allocation5] sm:$0x7]  ;;  %s257_s29 = sshll.u32 %s446_s2, 4  ;;  %s258_s29 = int_to_ptr.vmem [resolvable:$true] %s257_s29 }
  0x10   :  { %v74_v5 = vmul.f32 %v487_v3, %v487_v3  ;;  %v76_v6 = vmul.f32 %v489_v4, %v489_v4  ;;  %v312_v8 = vld [vmem:[#allocation7 + $0x38] sm:$0xff]  ;;  %v311_v9 = vld [vmem:[#allocation7 + $0x30] sm:$0xff]  ;;  %v310_v10 = vld [vmem:[#allocation7 + $0x28] sm:$0xff] }
  0x11   :  { %77 = vadd.xlane.f32.xlu2 %v73_v2  ;;  %230 = vmatpush.bf16.msra.mxu0 %v312_v8  ;;  %v309_v11 = vld [vmem:[#allocation7 + $0x20] sm:$0xff]  ;;  %v308_v12 = vld [vmem:[#allocation7 + $0x18] sm:$0xff]  ;;  %v307_v13 = vld [vmem:[#allocation7 + $0x10] sm:$0xff]  ;;  %v153_v2 = vperm.slane %v64_v55, 0 }
  0x12   :  { %313 = vmatpush.bf16.msra.mxu1 %v312_v8  ;;  %v306_v19 = vld [vmem:[#allocation7 + $0x8] sm:$0xff]  ;;  %v305_v22 = vld [vmem:[#allocation7] sm:$0xff] }
  0x15   :  { %231 = vmatpush.bf16.msra.mxu0 %v311_v9 }
  0x16   :  { %314 = vmatpush.bf16.msra.mxu1 %v311_v9 }
  0x17   :  { %71 = vadd.xlane.f32.xlu1 %v489_v4  ;;  %67 = vadd.xlane.f32.xlu0 %v487_v3 }
  0x19   :  { %79 = vadd.xlane.f32.xlu2 %v74_v5  ;;  %232 = vmatpush.bf16.msra.mxu0 %v310_v10 }
  0x1a   :  { %315 = vmatpush.bf16.msra.mxu1 %v310_v10 }
  0x1d   :  { %233 = vmatpush.bf16.msra.mxu0 %v309_v11 }
  0x1e   :  { %316 = vmatpush.bf16.msra.mxu1 %v309_v11  ;;  %v158_v11 = vperm.slane %v64_v55, 1 }
  0x1f   :  { %83 = vadd.xlane.f32.xlu1 %v76_v6  ;;  %81 = vadd.xlane.f32.xlu0 %v75_v7 }
  0x21   :  { %234 = vmatpush.bf16.msra.mxu0 %v308_v12 }
  0x22   :  { %317 = vmatpush.bf16.msra.mxu1 %v308_v12 }
  0x25   :  { %235 = vmatpush.bf16.msra.mxu0 %v307_v13 }
  0x26   :  { %318 = vmatpush.bf16.msra.mxu1 %v307_v13 }
  0x29   :  { %236 = vmatpush.bf16.msra.mxu0 %v306_v19 }
  0x2a   :  { %319 = vmatpush.bf16.msra.mxu1 %v306_v19 }
  0x2d   :  { %237 = vmatpush.bf16.msra.mxu0 %v305_v22 }
  0x2e   :  { %320 = vmatpush.bf16.msra.mxu1 %v305_v22 }
  0x82   :  { %v70_v14 = vpop.xlane.xlu1 %69  ;;  %v66_v15 = vpop.xlane.xlu0 %65 }
  0x83   :  { %v85_v16 = vmul.f32 0.0078125, %v66_v15  ;;  %v499_v29 = vmul.f32 0.0078125, %v70_v14 }
  0x84   :  { %v78_v17 = vpop.xlane.xlu2 %77 }
  0x85   :  { %v93_v18 = vmul.f32 %v85_v16, %v85_v16  ;;  %v89_v20 = vmul.f32 0.0078125, %v78_v17  ;;  %v95_v34 = vmul.f32 %v499_v29, %v499_v29  ;;  %v101_v58 = vsub.f32 %v481_v1, %v85_v16 }
  0x87   :  { %v97_v21 = vsub.f32 %v89_v20, %v93_v18 }
  0x89   :  { %v105_v23 = vadd.f32 1e-05, %v97_v21 }
  0x8a   :  { %v72_v24 = vpop.xlane.xlu1 %71  ;;  %v68_v25 = vpop.xlane.xlu0 %67 }
  0x8b   :  { %v86_v26 = vmul.f32 0.0078125, %v68_v25  ;;  %329 = vrsqrt.f32 %v105_v23  ;;  %v501_v31 = vmul.f32 0.0078125, %v72_v24  ;;  %vm115_vm1 = vweird.f32 %v105_v23 }
  0x8c   :  { %v80_v27 = vpop.xlane.xlu2 %79 }
  0x8d   :  { %v94_v28 = vmul.f32 %v86_v26, %v86_v26  ;;  %v90_v30 = vmul.f32 0.0078125, %v80_v27  ;;  %v96_v39 = vmul.f32 %v501_v31, %v501_v31  ;;  %v102_v7 = vsub.f32 %v487_v3, %v86_v26 }
  0x8e   :  { %v104_v17 = vsub.f32 %v489_v4, %v501_v31  ;;  %v103_v3 = vsub.f32 %v479_v0, %v499_v29  ;;  %v181_v31 = vperm.slane %v64_v55, 2 }
  0x8f   :  { %v98_v32 = vsub.f32 %v90_v30, %v94_v28 }
  0x91   :  { %v330_v33 = vpop.eup %329  ;;  %v106_v35 = vadd.f32 1e-05, %v98_v32 }
  0x92   :  { %v84_v36 = vpop.xlane.xlu1 %83  ;;  %v82_v37 = vpop.xlane.xlu0 %81  ;;  %v110_v38 = vmul.f32 %v330_v33, %v105_v23  ;;  %vm116_vm0 = vweird.f32 %v330_v33 }
  0x93   :  { %v92_v40 = vmul.f32 0.0078125, %v84_v36  ;;  %v91_v41 = vmul.f32 0.0078125, %v82_v37  ;;  %331 = vrsqrt.f32 %v106_v35  ;;  %vm117_vm2 = vmor %vm115_vm1, %vm116_vm0  ;;  %vm125_vm4 = vweird.f32 %v106_v35 }
  0x94   :  { %v111_v42 = vmul.f32 %v330_v33, %v110_v38 }
  0x95   :  { %v100_v43 = vsub.f32 %v92_v40, %v96_v39  ;;  %v99_v44 = vsub.f32 %v91_v41, %v95_v34 }
  0x96   :  { %v112_v45 = vmul.f32 0.5, %v111_v42 }
  0x97   :  { %v108_v46 = vadd.f32 1e-05, %v100_v43  ;;  %v107_v47 = vadd.f32 1e-05, %v99_v44 }
  0x98   :  { %v113_v48 = vsub.f32 1.5, %v112_v45 }
  0x99   :  { %333 = vrsqrt.f32 %v108_v46  ;;  %v332_v49 = vpop.eup %331  ;;  %vm145_vm8 = vweird.f32 %v108_v46  ;;  %vm135_vm10 = vweird.f32 %v107_v47 }
  0x9a   :  { %335 = vrsqrt.f32 %v107_v47  ;;  %v114_v50 = vmul.f32 %v330_v33, %v113_v48  ;;  %v120_v51 = vmul.f32 %v332_v49, %v106_v35  ;;  %vm126_vm3 = vweird.f32 %v332_v49 }
  0x9b   :  { %vm127_vm5 = vmor %vm125_vm4, %vm126_vm3 }
  0x9c   :  { %v121_v52 = vmul.f32 %v332_v49, %v120_v51  ;;  %v118_v56 = vsel %vm117_vm2, %v330_v33, %v114_v50 }
  0x9d   :  { %v149_v63 = vmul.f32 %v118_v56, %v101_v58 }
  0x9e   :  { %v122_v54 = vmul.f32 0.5, %v121_v52 }
  0x9f   :  { %v334_v53 = vpop.eup %333  ;;  %v154_v13 = vmul.f32 %v153_v2, %v149_v63 }
  0xa0   :  { %v336_v57 = vpop.eup %335  ;;  %v140_v59 = vmul.f32 %v334_v53, %v108_v46  ;;  %v123_v60 = vsub.f32 1.5, %v122_v54  ;;  %vm146_vm6 = vweird.f32 %v334_v53 }
  0xa1   :  { %v130_v61 = vmul.f32 %v336_v57, %v107_v47  ;;  %vm136_vm7 = vweird.f32 %v336_v57  ;;  %vm147_vm9 = vmor %vm145_vm8, %vm146_vm6  ;;  %v159_v19 = vadd.f32 %v158_v11, %v154_v13 }
  0xa2   :  { %v141_v62 = vmul.f32 %v334_v53, %v140_v59  ;;  %v124_v5 = vmul.f32 %v332_v49, %v123_v60  ;;  %vm137_vm11 = vmor %vm135_vm10, %vm136_vm7 }
  0xa3   :  { %v131_v6 = vmul.f32 %v336_v57, %v130_v61 }
  0xa4   :  { %v142_v8 = vmul.f32 0.5, %v141_v62  ;;  %v128_v10 = vsel %vm127_vm5, %v332_v49, %v124_v5 }
  0xa5   :  { %v132_v9 = vmul.f32 0.5, %v131_v6  ;;  %v150_v1 = vmul.f32 %v128_v10, %v102_v7 }
  0xa6   :  { %v143_v12 = vsub.f32 1.5, %v142_v8 }
  0xa7   :  { %v133_v14 = vsub.f32 1.5, %v132_v9  ;;  %v155_v16 = vmul.f32 %v153_v2, %v150_v1 }
  0xa8   :  { %v144_v15 = vmul.f32 %v334_v53, %v143_v12 }
  0xa9   :  { %v134_v18 = vmul.f32 %v336_v57, %v133_v14  ;;  %v160_v20 = vadd.f32 %v158_v11, %v155_v16 }
  0xaa   :  { %v148_v21 = vsel %vm147_vm9, %v334_v53, %v144_v15 }
  0xab   :  { %v138_v22 = vsel %vm137_vm11, %v336_v57, %v134_v18  ;;  %v152_v23 = vmul.f32 %v148_v21, %v104_v17  ;;  %v163_v24 = vpack.c.bf16 %v160_v20, %v159_v19 }
  0xac   :  { %v151_v25 = vmul.f32 %v138_v22, %v103_v3 }
  0xad   :  { %v157_v26 = vmul.f32 %v153_v2, %v152_v23  ;;  %238 = vmatmul.bf16.vlgmr.msra.gmra.mxu0 %v163_v24 }
  0xae   :  { %v156_v27 = vmul.f32 %v153_v2, %v151_v25 }
  0xaf   :  { %v162_v28 = vadd.f32 %v158_v11, %v157_v26 }
  0xb0   :  { %v161_v30 = vadd.f32 %v158_v11, %v156_v27 }
  0xb2   :  { %v164_v4 = vpack.c.bf16 %v162_v28, %v161_v30 }
  0xb4   :  { %243 = vmatmul.bf16.vlgmr.msra.gmra.mxu1 %v164_v4 }
 0x12a   :  { %v239_v32 = vpop.f32.mrf.mxu0 }
 0x12b   :  { %v240_v33 = vadd.f32 %v239_v32, %v181_v31 }
 0x12d   :  { %249 = vst [vmem:[#allocation8] sm:$0xff] %v240_v33 }
 0x131   :  { %v244_v0 = vpop.f32.mrf.mxu1 }
 0x132   :  { %v245_v29 = vadd.f32 %v244_v0, %v181_v31  ;;  %v241_v34 = vpop.f32.mrf.mxu0 }
 0x133   :  { %v242_v35 = vadd.f32 %v241_v34, %v181_v31 }
 0x134   :  { %251 = vst [vmem:[#allocation8 + $0x10] sm:$0xff] %v245_v29 }
 0x135   :  { %250 = vst [vmem:[#allocation8 + $0x8] sm:$0xff] %v242_v35 }
 0x139   :  { %v246_v36 = vpop.f32.mrf.mxu1 }
 0x13a   :  { %v247_v37 = vadd.f32 %v246_v36, %v181_v31 }
 0x13c   :  { %252 = vst [vmem:[#allocation8 + $0x18] sm:$0xff] %v247_v37 }
 0x13d   :  { %265 = dma.vmem_to_hbm [thread:$0]  %s258_s29, 512, %s260_s5, [#allocation4], %s441_s22, %s441_s22, %s442_s23  }
 0x13e   :  { %437 = dma.done.wait [#allocation4], 512  }
 0x13f   :  { %438 = vsyncadd [#allocation4], 4294966784 }
 0x140   :  { %270 = vsyncpa [#allocation3], 1 }
 0x141   :  { %271 = vsyncpa [#allocation6], 1 }
 0x142   :  { %272 = vsyncpa [#allocation4], 1 }

</bundles_post_ra>
